<compile_context>
chip_gen: v5e
topology: v5e:2x2
jax: 0.10.0
libtpu: 0.0.40
codegen_flags: <defaults>
</compile_context>

<pallas_src>
import jax
import jax.numpy as jnp
from jax import lax
from jax.experimental import pallas as pl
from jax.experimental.pallas import tpu as pltpu

LN_EPS = 1e-5


def _layernorm_cols(h):
    """LayerNorm over axis 0 (features) of an (H, tile_b) activation.

    Single-pass statistics; gamma/beta are folded into the next Linear on the host.
    """
    mu = jnp.mean(h, axis=0, keepdims=True)
    var = jnp.mean(h * h, axis=0, keepdims=True) - mu * mu
    return (h - mu) * lax.rsqrt(var + LN_EPS)


def drift_predict_kernel(x_ref, w1_ref, b1_ref, w2_ref, b2_ref, wpt_ref, bp_ref,
                         o_ref):
    # x block in the caller's layout: (tile_b, D), batch on sublanes.
    x = x_ref[...].astype(jnp.float32)

    w1 = w1_ref[...]     # bf16 (H, D)
    b1 = b1_ref[...]     # f32  (H, 1)
    w2 = w2_ref[...]     # bf16 (H, H)  -- LN1 gamma/beta folded in
    b2 = b2_ref[...]     # f32  (H, 1)
    wpt = wpt_ref[...]   # bf16 (H, D)  -- LN2 gamma/beta and 0.1 folded in, pre-transposed
    bp = bp_ref[...]     # f32  (1, D)

    # Block 1: h1^T = W1 @ x^T via contraction over the last dim of both
    # operands (NT pattern) -> (H, tile_b); hidden state is lane-dense.
    h = lax.dot_general(w1, x.astype(jnp.bfloat16), (((1,), (1,)), ((), ())),
                        preferred_element_type=jnp.float32)
    h = jnp.maximum(h + b1, 0.0)
    z = _layernorm_cols(h)

    # Block 2: standard (H, H) @ (H, tile_b) matmul, still lane-dense.
    h = jnp.dot(w2, z.astype(jnp.bfloat16), preferred_element_type=jnp.float32)
    h = jnp.maximum(h + b2, 0.0)
    z = _layernorm_cols(h)

    # Predictor + residual: one small f32 transpose back to (tile_b, H) so the
    # matmul result lands directly in the store layout (tile_b, D).
    zt = z.T
    p = jnp.dot(zt.astype(jnp.bfloat16), wpt, preferred_element_type=jnp.float32)
    o_ref[...] = (p + bp + x).astype(o_ref.dtype)


def _fold_params(params):
    """Fold LN affine params and the 0.1 predictor scale into the Linears.

    Returns MXU-ready bf16 weights and f32 biases in kernel layouts.
    """
    w1, b1, g1, be1, w2, b2, g2, be2, wp, bp = params
    f32 = jnp.float32
    w1 = w1.astype(f32)
    w2 = w2.astype(f32)
    wp = wp.astype(f32)
    # LayerNorm1 affine folded into Linear2; LayerNorm2 affine and 0.1 into predictor.
    w2f = w2 * g1.astype(f32)[None, :]
    b2f = w2 @ be1.astype(f32) + b2.astype(f32)
    wpf = 0.1 * (wp * g2.astype(f32)[None, :])
    bpf = 0.1 * (wp @ be2.astype(f32) + bp.astype(f32))
    return (w1.astype(jnp.bfloat16),
            b1.astype(f32).reshape(-1, 1),
            w2f.astype(jnp.bfloat16),
            b2f.reshape(-1, 1),
            wpf.T.astype(jnp.bfloat16),      # (H, D)
            bpf.reshape(1, -1))              # (1, D)


def _pick_tile(batch, tile_b):
    if batch < 256:
        return batch                          # single full-rows block
    # Aim for >=4 grid steps (keeps both v7x TensorCores busy along the
    # "parallel" axis) while capping per-step rows; multiple of 8 sublanes
    # (we use multiples of 128 so the lane-dense intermediates stay full).
    return min(tile_b, max(128, (pl.cdiv(batch, 4) // 128) * 128))


def drift_predict_forward(x, params, tile_b=4096):
    """x: (batch, input_dim) -> (batch, input_dim)."""
    w1, b1, w2f, b2f, wpt, bpf = _fold_params(params)
    B, D = x.shape
    tb = _pick_tile(B, tile_b)
    grid = (pl.cdiv(B, tb),)

    data_spec = pl.BlockSpec((tb, D), lambda i: (i, 0))

    def const(a):   # weights / biases stay VMEM-resident across grid steps
        return pl.BlockSpec(a.shape, lambda i: (0,) * a.ndim)

    return pl.pallas_call(
        drift_predict_kernel,
        grid=grid,
        in_specs=[data_spec,
                  const(w1), const(b1), const(w2f), const(b2f),
                  const(wpt), const(bpf)],
        out_specs=data_spec,
        out_shape=jax.ShapeDtypeStruct((B, D), x.dtype),
        compiler_params=pltpu.CompilerParams(
            dimension_semantics=("parallel",),
            vmem_limit_bytes=32 * 1024 * 1024,
        ),
    )(x, w1, b1, w2f, b2f, wpt, bpf)


def init_params(key, input_dim, hidden_dim=16, dtype=jnp.float32):
    """PyTorch-style init: Linear weights (out, in), biases (out,), LN params (dim,)."""
    ks = jax.random.split(key, 6)

    def linear(kw, kb, fan_in, fan_out):
        bound = fan_in ** -0.5
        w = jax.random.uniform(kw, (fan_out, fan_in), dtype, -bound, bound)
        b = jax.random.uniform(kb, (fan_out,), dtype, -bound, bound)
        return w, b

    w1, b1 = linear(ks[0], ks[1], input_dim, hidden_dim)
    w2, b2 = linear(ks[2], ks[3], hidden_dim, hidden_dim)
    wp, bp = linear(ks[4], ks[5], hidden_dim, input_dim)
    g1 = jnp.ones((hidden_dim,), dtype)
    be1 = jnp.zeros((hidden_dim,), dtype)
    g2 = jnp.ones((hidden_dim,), dtype)
    be2 = jnp.zeros((hidden_dim,), dtype)
    return (w1, b1, g1, be1, w2, b2, g2, be2, wp, bp)


def reference_forward(x, params):
    """Pure-JAX f32 reference matching the PyTorch module semantics."""
    w1, b1, g1, be1, w2, b2, g2, be2, wp, bp = params

    def ln(h, g, be):
        mu = jnp.mean(h, axis=-1, keepdims=True)
        var = jnp.mean((h - mu) ** 2, axis=-1, keepdims=True)
        return (h - mu) * lax.rsqrt(var + LN_EPS) * g + be

    h = jnp.maximum(x @ w1.T + b1, 0.0)
    h = ln(h, g1, be1)
    h = jnp.maximum(h @ w2.T + b2, 0.0)
    h = ln(h, g2, be2)
    return 0.1 * (h @ wp.T + bp) + x


if __name__ == "__main__":
    batch, input_dim, hidden_dim = 256, 32, 16

    keys = jax.random.split(jax.random.PRNGKey(0), 7)
    x = jax.random.normal(keys[0], (batch, input_dim), jnp.float32)

    params = list(init_params(keys[1], input_dim, hidden_dim))
    # Non-trivial LayerNorm affine params so the host-side fold is exercised.
    params[2] = 1.0 + 0.1 * jax.random.normal(keys[2], (hidden_dim,), jnp.float32)
    params[3] = 0.1 * jax.random.normal(keys[3], (hidden_dim,), jnp.float32)
    params[6] = 1.0 + 0.1 * jax.random.normal(keys[4], (hidden_dim,), jnp.float32)
    params[7] = 0.1 * jax.random.normal(keys[5], (hidden_dim,), jnp.float32)
    params = tuple(params)

    ref = reference_forward(x, params)

    fwd = jax.jit(drift_predict_forward)
    out = jax.block_until_ready(fwd(x, params))

    assert out.shape == (batch, input_dim)
    # bf16 MXU operands (with f32 accumulation) => looser tolerance than the old
    # pure-f32 kernel; the 0.1 predictor scale and the exact f32 residual keep
    # the absolute error small.
    max_err = float(jnp.max(jnp.abs(out - ref)))
    assert jnp.allclose(out, ref, atol=3e-2, rtol=3e-2), (
        f"mismatch vs reference (max abs err {max_err})")

    print("KERNEL_OK")
</pallas_src>

<mosaic_0001>
module attributes {stable_mosaic.version = 11 : i64} {
  func.func @drift_predict_kernel(%arg0: i32, %arg1: memref<128x32xf32, #tpu.memory_space<vmem>>, %arg2: memref<16x32xbf16, #tpu.memory_space<vmem>>, %arg3: memref<16x1xf32, #tpu.memory_space<vmem>>, %arg4: memref<16x16xbf16, #tpu.memory_space<vmem>>, %arg5: memref<16x1xf32, #tpu.memory_space<vmem>>, %arg6: memref<16x32xbf16, #tpu.memory_space<vmem>>, %arg7: memref<1x32xf32, #tpu.memory_space<vmem>>, %arg8: memref<128x32xf32, #tpu.memory_space<vmem>>) attributes {dimension_semantics = [#tpu.dimension_semantics<parallel>], iteration_bounds = array<i64: 2>, scalar_prefetch = 0 : i64, scratch_operands = 0 : i64, tpu.core_type = #tpu.core_type<tc>, window_params = [{transform_indices = @transform_0, window_bounds = array<i64: 128, 32>}, {pipeline_mode = #tpu.pipeline_mode<synchronous>, transform_indices = @transform_1, window_bounds = array<i64: 16, 32>}, {pipeline_mode = #tpu.pipeline_mode<synchronous>, transform_indices = @transform_2, window_bounds = array<i64: 16, 1>}, {pipeline_mode = #tpu.pipeline_mode<synchronous>, transform_indices = @transform_3, window_bounds = array<i64: 16, 16>}, {pipeline_mode = #tpu.pipeline_mode<synchronous>, transform_indices = @transform_4, window_bounds = array<i64: 16, 1>}, {pipeline_mode = #tpu.pipeline_mode<synchronous>, transform_indices = @transform_5, window_bounds = array<i64: 16, 32>}, {pipeline_mode = #tpu.pipeline_mode<synchronous>, transform_indices = @transform_6, window_bounds = array<i64: 1, 32>}, {transform_indices = @transform_7, window_bounds = array<i64: 128, 32>}]} {
    %c0 = arith.constant 0 : index
    %c0_0 = arith.constant 0 : index
    %0 = vector.load %arg1[%c0, %c0_0] : memref<128x32xf32, #tpu.memory_space<vmem>>, vector<128x32xf32>
    %c0_1 = arith.constant 0 : index
    %c0_2 = arith.constant 0 : index
    %1 = vector.load %arg2[%c0_1, %c0_2] : memref<16x32xbf16, #tpu.memory_space<vmem>>, vector<16x32xbf16>
    %c0_3 = arith.constant 0 : index
    %c0_4 = arith.constant 0 : index
    %2 = vector.load %arg3[%c0_3, %c0_4] : memref<16x1xf32, #tpu.memory_space<vmem>>, vector<16x1xf32>
    %c0_5 = arith.constant 0 : index
    %c0_6 = arith.constant 0 : index
    %3 = vector.load %arg4[%c0_5, %c0_6] : memref<16x16xbf16, #tpu.memory_space<vmem>>, vector<16x16xbf16>
    %c0_7 = arith.constant 0 : index
    %c0_8 = arith.constant 0 : index
    %4 = vector.load %arg5[%c0_7, %c0_8] : memref<16x1xf32, #tpu.memory_space<vmem>>, vector<16x1xf32>
    %c0_9 = arith.constant 0 : index
    %c0_10 = arith.constant 0 : index
    %5 = vector.load %arg6[%c0_9, %c0_10] : memref<16x32xbf16, #tpu.memory_space<vmem>>, vector<16x32xbf16>
    %c0_11 = arith.constant 0 : index
    %c0_12 = arith.constant 0 : index
    %6 = vector.load %arg7[%c0_11, %c0_12] : memref<1x32xf32, #tpu.memory_space<vmem>>, vector<1x32xf32>
    %7 = arith.truncf %0 : vector<128x32xf32> to vector<128x32xbf16>
    %cst = arith.constant dense<0.000000e+00> : vector<16x128xf32>
    %8 = tpu.matmul %1, %7, %cst {dimension_numbers = #tpu.dot_dimension_numbers<[1], [1], [0], [0], [0, 0, 1, 0], [], []>} : vector<16x32xbf16>, vector<128x32xbf16>, vector<16x128xf32> -> vector<16x128xf32>
    %9 = vector.broadcast %2 : vector<16x1xf32> to vector<16x128xf32>
    %10 = arith.addf %8, %9 : vector<16x128xf32>
    %cst_13 = arith.constant 0.000000e+00 : f32
    %11 = vector.broadcast %cst_13 : f32 to vector<16x128xf32>
    %12 = arith.maximumf %10, %11 : vector<16x128xf32>
    %cst_14 = arith.constant dense<0.000000e+00> : vector<128xf32>
    %13 = vector.multi_reduction <add>, %12, %cst_14 [0] : vector<16x128xf32> to vector<128xf32>
    %14 = vector.shape_cast %13 : vector<128xf32> to vector<1x128xf32>
    %cst_15 = arith.constant 1.600000e+01 : f32
    %15 = vector.broadcast %cst_15 : f32 to vector<1x128xf32>
    %16 = arith.divf %14, %15 : vector<1x128xf32>
    %17 = arith.mulf %12, %12 : vector<16x128xf32>
    %cst_16 = arith.constant dense<0.000000e+00> : vector<128xf32>
    %18 = vector.multi_reduction <add>, %17, %cst_16 [0] : vector<16x128xf32> to vector<128xf32>
    %19 = vector.shape_cast %18 : vector<128xf32> to vector<1x128xf32>
    %cst_17 = arith.constant 1.600000e+01 : f32
    %20 = vector.broadcast %cst_17 : f32 to vector<1x128xf32>
    %21 = arith.divf %19, %20 : vector<1x128xf32>
    %22 = arith.mulf %16, %16 : vector<1x128xf32>
    %23 = arith.subf %21, %22 : vector<1x128xf32>
    %24 = vector.broadcast %16 : vector<1x128xf32> to vector<16x128xf32>
    %25 = arith.subf %12, %24 : vector<16x128xf32>
    %cst_18 = arith.constant 9.99999974E-6 : f32
    %26 = vector.broadcast %cst_18 : f32 to vector<1x128xf32>
    %27 = arith.addf %23, %26 : vector<1x128xf32>
    %28 = math.rsqrt %27 : vector<1x128xf32>
    %29 = vector.broadcast %28 : vector<1x128xf32> to vector<16x128xf32>
    %30 = arith.mulf %25, %29 : vector<16x128xf32>
    %31 = arith.truncf %30 : vector<16x128xf32> to vector<16x128xbf16>
    %cst_19 = arith.constant dense<0.000000e+00> : vector<16x128xf32>
    %32 = tpu.matmul %3, %31, %cst_19 {dimension_numbers = #tpu.dot_dimension_numbers<[1], [0], [0], [1], [0, 0, 1, 1], [], []>} : vector<16x16xbf16>, vector<16x128xbf16>, vector<16x128xf32> -> vector<16x128xf32>
    %33 = vector.broadcast %4 : vector<16x1xf32> to vector<16x128xf32>
    %34 = arith.addf %32, %33 : vector<16x128xf32>
    %cst_20 = arith.constant 0.000000e+00 : f32
    %35 = vector.broadcast %cst_20 : f32 to vector<16x128xf32>
    %36 = arith.maximumf %34, %35 : vector<16x128xf32>
    %cst_21 = arith.constant dense<0.000000e+00> : vector<128xf32>
    %37 = vector.multi_reduction <add>, %36, %cst_21 [0] : vector<16x128xf32> to vector<128xf32>
    %38 = vector.shape_cast %37 : vector<128xf32> to vector<1x128xf32>
    %cst_22 = arith.constant 1.600000e+01 : f32
    %39 = vector.broadcast %cst_22 : f32 to vector<1x128xf32>
    %40 = arith.divf %38, %39 : vector<1x128xf32>
    %41 = arith.mulf %36, %36 : vector<16x128xf32>
    %cst_23 = arith.constant dense<0.000000e+00> : vector<128xf32>
    %42 = vector.multi_reduction <add>, %41, %cst_23 [0] : vector<16x128xf32> to vector<128xf32>
    %43 = vector.shape_cast %42 : vector<128xf32> to vector<1x128xf32>
    %cst_24 = arith.constant 1.600000e+01 : f32
    %44 = vector.broadcast %cst_24 : f32 to vector<1x128xf32>
    %45 = arith.divf %43, %44 : vector<1x128xf32>
    %46 = arith.mulf %40, %40 : vector<1x128xf32>
    %47 = arith.subf %45, %46 : vector<1x128xf32>
    %48 = vector.broadcast %40 : vector<1x128xf32> to vector<16x128xf32>
    %49 = arith.subf %36, %48 : vector<16x128xf32>
    %cst_25 = arith.constant 9.99999974E-6 : f32
    %50 = vector.broadcast %cst_25 : f32 to vector<1x128xf32>
    %51 = arith.addf %47, %50 : vector<1x128xf32>
    %52 = math.rsqrt %51 : vector<1x128xf32>
    %53 = vector.broadcast %52 : vector<1x128xf32> to vector<16x128xf32>
    %54 = arith.mulf %49, %53 : vector<16x128xf32>
    %55 = tpu.transpose %54, [1, 0] : vector<16x128xf32> -> vector<128x16xf32>
    %56 = arith.truncf %55 : vector<128x16xf32> to vector<128x16xbf16>
    %cst_26 = arith.constant dense<0.000000e+00> : vector<128x32xf32>
    %57 = tpu.matmul %56, %5, %cst_26 {dimension_numbers = #tpu.dot_dimension_numbers<[1], [0], [0], [1], [0, 0, 1, 1], [], []>} : vector<128x16xbf16>, vector<16x32xbf16>, vector<128x32xf32> -> vector<128x32xf32>
    %58 = vector.broadcast %6 : vector<1x32xf32> to vector<128x32xf32>
    %59 = arith.addf %57, %58 : vector<128x32xf32>
    %60 = arith.addf %59, %0 : vector<128x32xf32>
    %c0_27 = arith.constant 0 : index
    %c0_28 = arith.constant 0 : index
    %61 = vector.load %arg8[%c0_27, %c0_28] : memref<128x32xf32, #tpu.memory_space<vmem>>, vector<128x32xf32>
    tpu.vector_store %arg8[%c0_27, %c0_28], %60 {strides = array<i32>} : memref<128x32xf32, #tpu.memory_space<vmem>>, vector<128x32xf32>,
    return
  }
  func.func @transform_0(%arg0: i32) -> (i32, i32) {
    %c0_i32 = arith.constant 0 : i32
    %c0_i32_0 = arith.constant 0 : i32
    return %arg0, %c0_i32 : i32, i32
  }
  func.func @transform_1(%arg0: i32) -> (i32, i32) {
    %c0_i32 = arith.constant 0 : i32
    %c0_i32_0 = arith.constant 0 : i32
    %c0_i32_1 = arith.constant 0 : i32
    return %c0_i32, %c0_i32_0 : i32, i32
  }
  func.func @transform_2(%arg0: i32) -> (i32, i32) {
    %c0_i32 = arith.constant 0 : i32
    %c0_i32_0 = arith.constant 0 : i32
    %c0_i32_1 = arith.constant 0 : i32
    return %c0_i32, %c0_i32_0 : i32, i32
  }
  func.func @transform_3(%arg0: i32) -> (i32, i32) {
    %c0_i32 = arith.constant 0 : i32
    %c0_i32_0 = arith.constant 0 : i32
    %c0_i32_1 = arith.constant 0 : i32
    return %c0_i32, %c0_i32_0 : i32, i32
  }
  func.func @transform_4(%arg0: i32) -> (i32, i32) {
    %c0_i32 = arith.constant 0 : i32
    %c0_i32_0 = arith.constant 0 : i32
    %c0_i32_1 = arith.constant 0 : i32
    return %c0_i32, %c0_i32_0 : i32, i32
  }
  func.func @transform_5(%arg0: i32) -> (i32, i32) {
    %c0_i32 = arith.constant 0 : i32
    %c0_i32_0 = arith.constant 0 : i32
    %c0_i32_1 = arith.constant 0 : i32
    return %c0_i32, %c0_i32_0 : i32, i32
  }
  func.func @transform_6(%arg0: i32) -> (i32, i32) {
    %c0_i32 = arith.constant 0 : i32
    %c0_i32_0 = arith.constant 0 : i32
    %c0_i32_1 = arith.constant 0 : i32
    return %c0_i32, %c0_i32_0 : i32, i32
  }
  func.func @transform_7(%arg0: i32) -> (i32, i32) {
    %c0_i32 = arith.constant 0 : i32
    %c0_i32_0 = arith.constant 0 : i32
    return %arg0, %c0_i32 : i32, i32
  }
}

</mosaic_0001>

<bundles_post_ra>
// kernel: drift_predict_forward.1
= control target key start
LH: loop header
LB: loop body
LE: loop exit
PB: predicated region body
PF: predicated region fallthrough
CT: control target
= control target key end

     0   :  { %s807_s24 = smov 0   ;;  %s1007_s0 = inlined_call_operand.vmem [shape: f32[256,32], index: 0, kind: input, shape index: {}]   ;;  %s1008_s1 = inlined_call_operand.vmem [shape: bf16[16,32], index: 1, kind: input, shape index: {}]   ;;  %s1009_s2 = inlined_call_operand.vmem [shape: f32[16,1], index: 2, kind: input, shape index: {}]   ;;  %s1010_s3 = inlined_call_operand.vmem [shape: bf16[16,16], index: 3, kind: input, shape index: {}]   ;;  %s1011_s4 = inlined_call_operand.vmem [shape: f32[16,1], index: 4, kind: input, shape index: {}]   ;;  %s1012_s5 = inlined_call_operand.vmem [shape: bf16[16,32], index: 5, kind: input, shape index: {}]   ;;  %s1013_s6 = inlined_call_operand.vmem [shape: f32[1,32], index: 6, kind: input, shape index: {}]   ;;  %s1014_s7 = inlined_call_operand.vmem [shape: f32[256,32], index: 7, kind: output, shape index: {}]  }
   0x1 LB: > { %s700_s25 = sadd.s32 4294967295, %s763_s24   ;;  %p704_p0 = scmp.ge.s32.totalorder %s763_s24, 1  ;;  %s763_s24 = sphi %s807_s24, %s17_s24  }
   0x2   : > { %p238_p1 = scmp.lt.s32.totalorder %s763_s24, 3 }
   0x4   : > { %p239_p2 = pnand %p704_p0, %p238_p1 }
   0x5   : > { %s705_s26 = sshll.u32 (!%p239_p2), %s700_s25, 4 }
   0x6   : > { %242 = sbr.rel (%p239_p2) target bundleno = 867 (0x363), region = 48  ;;  %p271_p3 = scmp.lt.s32.totalorder (!%p239_p2), %s705_s26, 31 }
   0xb   : > { %s1016_s26 = smov (!%p271_p3, %s705_s26), 31  ;;  %vm333_vm0 = vcmask 261120   ;;  %v301_v22 = vld [vmem:[%s1009_s2] sm:$0xff]  ;;  %v765_v23 = vmov 0   ;;  %v302_v28 = vld [vmem:[%s1009_s2 + $0x8] sm:$0xff]  ;;  %v766_v37 = vmov 16.0  }
   0xc   : > { %s706_s27 = sshll.u32 %s1016_s26, 3  ;;  %748 = vset.pattern.permute.xlu0 %v765_v23  ;;  %749 = vset.pattern.permute.xlu1 %v765_v23  ;;  %v733_v35 = vld [vmem:[%s1008_s1] sm:$0xff]  ;;  %751 = vrcp.f32 %v766_v37  ;;  %vm435_vm5 = vcmask 130048  }
   0xd   : > { %s823_s30 = scalar_lea.vmem %s1007_s0, %s706_s27  ;;  %320 = vperm.xlu0 %748, %v301_v22   ;;  %s939_s29 = scalar_lea.vmem %s1014_s7, %s706_s27 }
   0xe   : > { %v826_v0 = vld [vmem:[%s823_s30 + $0x70] sm:$0xff]  ;;  %v829_v1 = vld [vmem:[%s823_s30 + $0x78] sm:$0xff]  ;;  %v834_v3 = vld [vmem:[%s823_s30 + $0x60] sm:$0xff] }
   0xf   : > { %v317_v2 = vpack.c.bf16 %v829_v1, %v826_v0  ;;  %v837_v4 = vld [vmem:[%s823_s30 + $0x68] sm:$0xff]  ;;  %v844_v8 = vld [vmem:[%s823_s30 + $0x50] sm:$0xff]  ;;  %v847_v9 = vld [vmem:[%s823_s30 + $0x58] sm:$0xff] }
  0x10   : > { %v316_v6 = vpack.c.bf16 %v837_v4, %v834_v3  ;;  %v315_v10 = vpack.c.bf16 %v847_v9, %v844_v8  ;;  %v853_v12 = vld [vmem:[%s823_s30 + $0x40] sm:$0xff]  ;;  %v856_v13 = vld [vmem:[%s823_s30 + $0x48] sm:$0xff]  ;;  %v862_v16 = vld [vmem:[%s823_s30 + $0x30] sm:$0xff] }
  0x11   : > { %v359_v5 = vsel %vm333_vm0, %v317_v2, 0  ;;  %v314_v14 = vpack.c.bf16 %v856_v13, %v853_v12  ;;  %v865_v17 = vld [vmem:[%s823_s30 + $0x38] sm:$0xff]  ;;  %v871_v20 = vld [vmem:[%s823_s30 + $0x20] sm:$0xff]  ;;  %v874_v21 = vld [vmem:[%s823_s30 + $0x28] sm:$0xff] }
  0x12   : > { %361 = vmatpush.bf16.xpose.msra.mxu0 %v359_v5  ;;  %v356_v7 = vsel %vm333_vm0, %v316_v6, 0  ;;  %v353_v11 = vsel %vm333_vm0, %v315_v10, 0  ;;  %v313_v18 = vpack.c.bf16 %v865_v17, %v862_v16  ;;  %v312_v24 = vpack.c.bf16 %v874_v21, %v871_v20  ;;  %v883_v26 = vld [vmem:[%s823_s30 + $0x10] sm:$0xff]  ;;  %v886_v27 = vld [vmem:[%s823_s30 + $0x18] sm:$0xff]  ;;  %v895_v31 = vld [vmem:[%s823_s30] sm:$0xff]  ;;  %v752_v39 = vpop.eup %751 }
  0x13   : > { %v350_v15 = vsel %vm333_vm0, %v314_v14, 0  ;;  %v311_v29 = vpack.c.bf16 %v886_v27, %v883_v26  ;;  %v898_v32 = vld [vmem:[%s823_s30 + $0x8] sm:$0xff]  ;;  %v385_v43 = vmul.f32 16.0, %v752_v39  ;;  %vm389_vm1 = vweird.f32 %v752_v39  ;;  %v305_v10 = vld [vmem:[%s1011_s4] sm:$0xff] }
  0x14   : > { %v347_v19 = vsel %vm333_vm0, %v313_v18, 0  ;;  %v344_v25 = vsel %vm333_vm0, %v312_v24, 0  ;;  %v310_v33 = vpack.c.bf16 %v898_v32, %v895_v31  ;;  %422 = vperm.xlu1 %749, %v305_v10  }
  0x15   : > { %325 = vperm.xlu0 %748, %v302_v28   ;;  %v341_v30 = vsel %vm333_vm0, %v311_v29, 0  ;;  %v386_v47 = vsub.f32 1.0, %v385_v43 }
  0x16   : > { %v338_v34 = vsel %vm333_vm0, %v310_v33, 0 }
  0x17   : > { %v387_v53 = vmul.f32 %v752_v39, %v386_v47 }
  0x19   : > { %v388_v58 = vadd.f32 %v752_v39, %v387_v53 }
  0x1a   : > { %362 = vmatpush.bf16.xpose.msra.mxu0 %v356_v7 }
  0x1b   : > { %v390_v63 = vsel %vm389_vm1, %v752_v39, %v388_v58 }
  0x22   : > { %363 = vmatpush.bf16.xpose.msra.mxu0 %v353_v11 }
  0x2a   : > { %364 = vmatpush.bf16.xpose.msra.mxu0 %v350_v15 }
  0x32   : > { %365 = vmatpush.bf16.xpose.msra.mxu0 %v347_v19  ;;  %v306_v19 = vld [vmem:[%s1011_s4 + $0x8] sm:$0xff] }
  0x33   : > { %427 = vperm.xlu1 %749, %v306_v19  }
  0x3a   : > { %366 = vmatpush.bf16.xpose.msra.mxu0 %v344_v25 }
  0x42   : > { %367 = vmatpush.bf16.xpose.msra.mxu0 %v341_v30 }
  0x4a   : > { %368 = vmatpush.bf16.xpose.msra.mxu0 %v338_v34 }
  0x51   : > { %713 = vmatmul.msk.bf16.vlgmr.msra.gmra.mxu0 %vm333_vm0, %v733_v35 }
  0x7f   : > { %v321_v36 = vpop.permute.xlu0 %320 }
  0x86   : > { %v423_v39 = vpop.permute.xlu1 %422 }
  0x87   : > { %v326_v41 = vpop.permute.xlu0 %325 }
  0xce   : > { %v370_v38 = vpop.f32.mrf.mxu0 }
  0xcf   : > { %v371_v40 = vadd.f32 %v370_v38, %v321_v36  ;;  %v734_v38 = vld [vmem:[%s1010_s3] sm:$0xff] }
  0xd1   : > { %v375_v44 = vmax.f32 %v371_v40, 0.0 }
  0xd3   : > { %v392_v48 = vmul.f32 %v375_v44, %v375_v44 }
  0xd6   : > { %v372_v42 = vpop.f32.mrf.mxu0 }
  0xd7   : > { %v373_v45 = vadd.f32 %v372_v42, %v326_v41  ;;  %v428_v42 = vpop.permute.xlu1 %427 }
  0xd9   : > { %v376_v46 = vmax.f32 %v373_v45, 0.0 }
  0xdb   : > { %v377_v49 = vadd.f32 %v376_v46, %v375_v44  ;;  %v393_v50 = vmul.f32 %v376_v46, %v376_v46 }
  0xdd   : > { %v378_v51 = vrot.slane %v377_v49, 4  ;;  %v394_v52 = vadd.f32 %v393_v50, %v392_v48 }
  0xdf   : > { %v379_v54 = vadd.f32 %v378_v51, %v377_v49  ;;  %v395_v55 = vrot.slane %v394_v52, 4 }
  0xe1   : > { %v380_v56 = vrot.slane %v379_v54, 2  ;;  %v396_v57 = vadd.f32 %v395_v55, %v394_v52 }
  0xe3   : > { %v381_v59 = vadd.f32 %v380_v56, %v379_v54  ;;  %v397_v60 = vrot.slane %v396_v57, 2 }
  0xe5   : > { %v382_v61 = vrot.slane %v381_v59, 1  ;;  %v398_v62 = vadd.f32 %v397_v60, %v396_v57 }
  0xe7   : > { %v399_v2 = vrot.slane %v398_v62, 1  ;;  %v383_v5 = vadd.f32 %v382_v61, %v381_v59 }
  0xe9   : > { %v400_v6 = vadd.f32 %v399_v2, %v398_v62  ;;  %v391_v7 = vmul.f32 %v390_v63, %v383_v5 }
  0xeb   : > { %v401_v11 = vmul.f32 %v400_v6, %v390_v63  ;;  %v402_v14 = vmul.f32 %v391_v7, %v391_v7  ;;  %v404_v30 = vsub.f32 %v375_v44, %v391_v7  ;;  %v405_v33 = vsub.f32 %v376_v46, %v391_v7 }
  0xed   : > { %v403_v15 = vsub.f32 %v401_v11, %v402_v14 }
  0xef   : > { %v406_v18 = vadd.f32 1e-05, %v403_v15 }
  0xf1   : > { %753 = vrsqrt.f32 %v406_v18  ;;  %vm413_vm3 = vweird.f32 %v406_v18 }
  0xf7   : > { %v754_v22 = vpop.eup %753 }
  0xf8   : > { %v408_v23 = vmul.f32 %v754_v22, %v406_v18  ;;  %vm414_vm2 = vweird.f32 %v754_v22 }
  0xf9   : > { %vm415_vm4 = vmor %vm413_vm3, %vm414_vm2 }
  0xfa   : > { %v409_v24 = vmul.f32 %v754_v22, %v408_v23 }
  0xfc   : > { %v410_v25 = vmul.f32 0.5, %v409_v24 }
  0xfe   : > { %v411_v28 = vsub.f32 1.5, %v410_v25 }
 0x100   : > { %v412_v29 = vmul.f32 %v754_v22, %v411_v28 }
 0x102   : > { %v416_v34 = vsel %vm415_vm4, %v754_v22, %v412_v29 }
 0x103   : > { %v417_v35 = vmul.f32 %v416_v34, %v404_v30  ;;  %v418_v36 = vmul.f32 %v416_v34, %v405_v33 }
 0x105   : > { %v419_v37 = vpack.c.bf16 %v418_v36, %v417_v35 }
 0x107   : > { %446 = vmatpush.bf16.msra.mxu1 %v419_v37 }
 0x10a   : > { %718 = vmatmul.msk.bf16.vlgmr.msra.gmra.mxu1 %vm435_vm5, %v734_v38 }
 0x187   : > { %v448_v40 = vpop.f32.mrf.mxu1 }
 0x188   : > { %v449_v41 = vadd.f32 %v448_v40, %v423_v39 }
 0x18a   : > { %v453_v44 = vmax.f32 %v449_v41, 0.0 }
 0x18c   : > { %v463_v47 = vmul.f32 %v453_v44, %v453_v44 }
 0x18f   : > { %v450_v43 = vpop.f32.mrf.mxu1 }
 0x190   : > { %v451_v45 = vadd.f32 %v450_v43, %v428_v42 }
 0x192   : > { %v454_v46 = vmax.f32 %v451_v45, 0.0 }
 0x194   : > { %v455_v48 = vadd.f32 %v454_v46, %v453_v44  ;;  %v464_v49 = vmul.f32 %v454_v46, %v454_v46 }
 0x196   : > { %v456_v50 = vrot.slane %v455_v48, 4  ;;  %v465_v51 = vadd.f32 %v464_v49, %v463_v47 }
 0x198   : > { %v457_v52 = vadd.f32 %v456_v50, %v455_v48  ;;  %v466_v53 = vrot.slane %v465_v51, 4 }
 0x19a   : > { %v458_v54 = vrot.slane %v457_v52, 2  ;;  %v467_v55 = vadd.f32 %v466_v53, %v465_v51 }
 0x19c   : > { %v459_v56 = vadd.f32 %v458_v54, %v457_v52  ;;  %v468_v57 = vrot.slane %v467_v55, 2 }
 0x19e   : > { %v469_v58 = vadd.f32 %v468_v57, %v467_v55  ;;  %v460_v59 = vrot.slane %v459_v56, 1 }
 0x1a0   : > { %v470_v60 = vrot.slane %v469_v58, 1  ;;  %v461_v61 = vadd.f32 %v460_v59, %v459_v56  ;;  %v931_v56 = vld [vmem:[%s1013_s6] ss:$0 sm:$0xff] }
 0x1a2   : > { %v462_v62 = vmul.f32 %v461_v61, %v390_v63  ;;  %v471_v2 = vadd.f32 %v470_v60, %v469_v58 }
 0x1a4   : > { %v472_v5 = vmul.f32 %v471_v2, %v390_v63  ;;  %v473_v6 = vmul.f32 %v462_v62, %v462_v62  ;;  %v475_v23 = vsub.f32 %v453_v44, %v462_v62  ;;  %v476_v28 = vsub.f32 %v454_v46, %v462_v62  ;;  %v735_v63 = vld [vmem:[%s1012_s5] sm:$0xff] }
 0x1a5   : > { %570 = vmatpush.bf16.msra.mxu2 %v735_v63  ;;  %736 = vmatpush.bf16.msra.mxu3 %v735_v63 }
 0x1a6   : > { %v474_v7 = vsub.f32 %v472_v5, %v473_v6 }
 0x1a8   : > { %v477_v10 = vadd.f32 1e-05, %v474_v7 }
 0x1aa   : > { %755 = vrsqrt.f32 %v477_v10  ;;  %vm484_vm7 = vweird.f32 %v477_v10 }
 0x1b0   : > { %v756_v11 = vpop.eup %755 }
 0x1b1   : > { %v479_v14 = vmul.f32 %v756_v11, %v477_v10  ;;  %vm485_vm6 = vweird.f32 %v756_v11 }
 0x1b2   : > { %vm486_vm8 = vmor %vm484_vm7, %vm485_vm6 }
 0x1b3   : > { %v480_v15 = vmul.f32 %v756_v11, %v479_v14 }
 0x1b5   : > { %v481_v18 = vmul.f32 0.5, %v480_v15 }
 0x1b7   : > { %v482_v19 = vsub.f32 1.5, %v481_v18 }
 0x1b9   : > { %v483_v22 = vmul.f32 %v756_v11, %v482_v19 }
 0x1bb   : > { %v487_v24 = vsel %vm486_vm8, %v756_v11, %v483_v22 }
 0x1bc   : > { %v488_v25 = vmul.f32 %v487_v24, %v475_v23  ;;  %v489_v29 = vmul.f32 %v487_v24, %v476_v28 }
 0x1be   : > { %490 = vxpose.xlu2.b32.start [1/2] (short) %v488_v25, 128 }
 0x1c6   : > { %491 = vxpose.xlu2.b32.end [2/2] (short) %v489_v29, 128 }
 0x257   : > { %v506_v30 = vpop.trf.xlu2 }
 0x25f   : > { %v507_v33 = vpop.trf.xlu2 }
 0x260   : > { %v522_v34 = vpack.c.bf16 %v507_v33, %v506_v30 }
 0x262   : > { %723 = vmatmul.msk.bf16.vlgmr.msra.gmra.mxu2 %vm435_vm5, %v522_v34 }
 0x267   : > { %v508_v35 = vpop.trf.xlu2 }
 0x26f   : > { %v509_v36 = vpop.trf.xlu2 }
 0x270   : > { %v523_v37 = vpack.c.bf16 %v509_v36, %v508_v35 }
 0x272   : > { %724 = vmatmul.msk.bf16.gmra.mxu2 %vm435_vm5, %v523_v37 }
 0x277   : > { %v510_v38 = vpop.trf.xlu2 }
 0x27f   : > { %v511_v39 = vpop.trf.xlu2 }
 0x280   : > { %v524_v40 = vpack.c.bf16 %v511_v39, %v510_v38 }
 0x282   : > { %725 = vmatmul.msk.bf16.gmra.mxu2 %vm435_vm5, %v524_v40 }
 0x287   : > { %v512_v41 = vpop.trf.xlu2 }
 0x28f   : > { %v513_v42 = vpop.trf.xlu2 }
 0x290   : > { %v525_v43 = vpack.c.bf16 %v513_v42, %v512_v41 }
 0x292   : > { %726 = vmatmul.msk.bf16.gmra.mxu2 %vm435_vm5, %v525_v43 }
 0x297   : > { %v514_v44 = vpop.trf.xlu2 }
 0x29f   : > { %v515_v45 = vpop.trf.xlu2 }
 0x2a0   : > { %v526_v46 = vpack.c.bf16 %v515_v45, %v514_v44 }
 0x2a2   : > { %727 = vmatmul.msk.bf16.vlgmr.msra.gmra.mxu3 %vm435_vm5, %v526_v46 }
 0x2a7   : > { %v516_v47 = vpop.trf.xlu2 }
 0x2af   : > { %v517_v48 = vpop.trf.xlu2 }
 0x2b0   : > { %v527_v49 = vpack.c.bf16 %v517_v48, %v516_v47 }
 0x2b2   : > { %728 = vmatmul.msk.bf16.gmra.mxu3 %vm435_vm5, %v527_v49 }
 0x2b7   : > { %v518_v50 = vpop.trf.xlu2 }
 0x2bf   : > { %v519_v51 = vpop.trf.xlu2 }
 0x2c0   : > { %v528_v52 = vpack.c.bf16 %v519_v51, %v518_v50 }
 0x2c2   : > { %729 = vmatmul.msk.bf16.gmra.mxu3 %vm435_vm5, %v528_v52 }
 0x2c7   : > { %v520_v53 = vpop.trf.xlu2 }
 0x2cf   : > { %v521_v54 = vpop.trf.xlu2 }
 0x2d0   : > { %v529_v55 = vpack.c.bf16 %v521_v54, %v520_v53 }
 0x2d2   : > { %730 = vmatmul.msk.bf16.gmra.mxu3 %vm435_vm5, %v529_v55 }
 0x2e5   : > { %v572_v57 = vpop.f32.mrf.mxu2 }
 0x2e6   : > { %v573_v58 = vadd.f32 %v931_v56, %v572_v57 }
 0x2e8   : > { %v612_v59 = vadd.f32 %v573_v58, %v895_v31 }
 0x2ea   : > { %628 = vst.msk [vmem:[%s939_s29] sm:$0xff] %vm333_vm0, %v612_v59 }
 0x2ed   : > { %v574_v60 = vpop.f32.mrf.mxu2 }
 0x2ee   : > { %v575_v61 = vadd.f32 %v931_v56, %v574_v60 }
 0x2f0   : > { %v613_v62 = vadd.f32 %v575_v61, %v898_v32 }
 0x2f2   : > { %629 = vst.msk [vmem:[%s939_s29 + $0x8] sm:$0xff] %vm333_vm0, %v613_v62 }
 0x2f5   : > { %v577_v2 = vpop.f32.mrf.mxu2 }
 0x2f6   : > { %v578_v5 = vadd.f32 %v931_v56, %v577_v2 }
 0x2f8   : > { %v614_v6 = vadd.f32 %v578_v5, %v883_v26 }
 0x2fa   : > { %630 = vst.msk [vmem:[%s939_s29 + $0x10] sm:$0xff] %vm333_vm0, %v614_v6 }
 0x2fd   : > { %v579_v31 = vpop.f32.mrf.mxu2 }
 0x2fe   : > { %v580_v7 = vadd.f32 %v931_v56, %v579_v31 }
 0x300   : > { %v615_v10 = vadd.f32 %v580_v7, %v886_v27 }
 0x302   : > { %631 = vst.msk [vmem:[%s939_s29 + $0x18] sm:$0xff] %vm333_vm0, %v615_v10 }
 0x305   : > { %v582_v32 = vpop.f32.mrf.mxu2 }
 0x306   : > { %v583_v11 = vadd.f32 %v931_v56, %v582_v32 }
 0x308   : > { %v616_v14 = vadd.f32 %v583_v11, %v871_v20 }
 0x30a   : > { %632 = vst.msk [vmem:[%s939_s29 + $0x20] sm:$0xff] %vm333_vm0, %v616_v14 }
 0x30d   : > { %v584_v26 = vpop.f32.mrf.mxu2 }
 0x30e   : > { %v585_v15 = vadd.f32 %v931_v56, %v584_v26 }
 0x310   : > { %v617_v18 = vadd.f32 %v585_v15, %v874_v21 }
 0x312   : > { %633 = vst.msk [vmem:[%s939_s29 + $0x28] sm:$0xff] %vm333_vm0, %v617_v18 }
 0x315   : > { %v587_v27 = vpop.f32.mrf.mxu2 }
 0x316   : > { %v588_v19 = vadd.f32 %v931_v56, %v587_v27 }
 0x318   : > { %v618_v22 = vadd.f32 %v588_v19, %v862_v16 }
 0x31a   : > { %634 = vst.msk [vmem:[%s939_s29 + $0x30] sm:$0xff] %vm333_vm0, %v618_v22 }
 0x31d   : > { %v589_v20 = vpop.f32.mrf.mxu2 }
 0x31e   : > { %v590_v23 = vadd.f32 %v931_v56, %v589_v20 }
 0x320   : > { %v619_v24 = vadd.f32 %v590_v23, %v865_v17 }
 0x322   : > { %635 = vst.msk [vmem:[%s939_s29 + $0x38] sm:$0xff] %vm333_vm0, %v619_v24 }
 0x325   : > { %v592_v21 = vpop.f32.mrf.mxu3 }
 0x326   : > { %v593_v25 = vadd.f32 %v931_v56, %v592_v21 }
 0x328   : > { %v620_v28 = vadd.f32 %v593_v25, %v853_v12 }
 0x32a   : > { %636 = vst.msk [vmem:[%s939_s29 + $0x40] sm:$0xff] %vm333_vm0, %v620_v28 }
 0x32d   : > { %v594_v16 = vpop.f32.mrf.mxu3 }
 0x32e   : > { %v595_v29 = vadd.f32 %v931_v56, %v594_v16 }
 0x330   : > { %v621_v63 = vadd.f32 %v595_v29, %v856_v13 }
 0x332   : > { %637 = vst.msk [vmem:[%s939_s29 + $0x48] sm:$0xff] %vm333_vm0, %v621_v63 }
 0x335   : > { %v597_v17 = vpop.f32.mrf.mxu3 }
 0x336   : > { %v598_v30 = vadd.f32 %v931_v56, %v597_v17 }
 0x338   : > { %v622_v33 = vadd.f32 %v598_v30, %v844_v8 }
 0x33a   : > { %638 = vst.msk [vmem:[%s939_s29 + $0x50] sm:$0xff] %vm333_vm0, %v622_v33 }
 0x33d   : > { %v599_v12 = vpop.f32.mrf.mxu3 }
 0x33e   : > { %v600_v34 = vadd.f32 %v931_v56, %v599_v12 }
 0x340   : > { %v623_v35 = vadd.f32 %v600_v34, %v847_v9 }
 0x342   : > { %639 = vst.msk [vmem:[%s939_s29 + $0x58] sm:$0xff] %vm333_vm0, %v623_v35 }
 0x345   : > { %v602_v13 = vpop.f32.mrf.mxu3 }
 0x346   : > { %v603_v36 = vadd.f32 %v931_v56, %v602_v13 }
 0x348   : > { %v624_v37 = vadd.f32 %v603_v36, %v834_v3 }
 0x34a   : > { %640 = vst.msk [vmem:[%s939_s29 + $0x60] sm:$0xff] %vm333_vm0, %v624_v37 }
 0x34d   : > { %v604_v38 = vpop.f32.mrf.mxu3 }
 0x34e   : > { %v605_v8 = vadd.f32 %v931_v56, %v604_v38 }
 0x350   : > { %v625_v39 = vadd.f32 %v605_v8, %v837_v4 }
 0x352   : > { %641 = vst.msk [vmem:[%s939_s29 + $0x68] sm:$0xff] %vm333_vm0, %v625_v39 }
 0x355   : > { %v607_v40 = vpop.f32.mrf.mxu3 }
 0x356   : > { %v608_v9 = vadd.f32 %v931_v56, %v607_v40 }
 0x358   : > { %v626_v41 = vadd.f32 %v608_v9, %v826_v0 }
 0x35a   : > { %642 = vst.msk [vmem:[%s939_s29 + $0x70] sm:$0xff] %vm333_vm0, %v626_v41 }
 0x35d   : > { %v609_v42 = vpop.f32.mrf.mxu3 }
 0x35e   : > { %v610_v43 = vadd.f32 %v931_v56, %v609_v42 }
 0x360   : > { %v627_v3 = vadd.f32 %v610_v43, %v829_v1 }
 0x362   : > { %643 = vst.msk [vmem:[%s939_s29 + $0x78] sm:$0xff] %vm333_vm0, %v627_v3 }
 0x363 PF: > { %s17_s24 = sadd.s32 1, %s763_s24  }
 0x364   : > { %p14_p4 = scmp.ge.s32.totalorder %s17_s24, 4  }
 0x366   :  { %16 = sbr.rel (!%p14_p4) target bundleno = 1 (0x1), region = 78 }

</bundles_post_ra>
